<compile_context>
chip_gen: v7x
topology: tpu7x:2x2x1
jax: 0.10.0
libtpu: 0.0.40
codegen_flags: <defaults>
</compile_context>

<pallas_src>
import numpy as np
import jax
import jax.numpy as jnp
from jax import lax
from jax.experimental import pallas as pl
from jax.experimental.pallas import tpu as pltpu

NUM_BOND_TYPE = 6
NUM_BOND_DIRECTION = 3
NUM_ATOM_TYPE = 120
NUM_CHIRALITY_TAG = 3
BN_EPS = 1e-5

LANE = 128   # both feature axes and the node axis are padded to this


def _round_up(x, m):
    return ((x + m - 1) // m) * m


def _vmem_limit_bytes(resident_bytes):
    """Generation-aware VMEM request: enough for the resident working set plus
    headroom, never the full physical VMEM (v7x has only 64 MiB per core)."""
    try:
        cap = int(pltpu.get_tpu_info().vmem_capacity_bytes)
    except Exception:  # pragma: no cover - info query unavailable
        cap = 64 * 1024 * 1024
    want = int(resident_bytes * 3 // 2) + (8 << 20)
    want = max(want, 32 << 20)
    return int(min(want, cap * 3 // 4))


# ---------------------------------------------------------------------------
# Pallas kernel: the WHOLE GIN stack in one invocation; h carried in vregs.
# ---------------------------------------------------------------------------
def _gnn_stack_kernel(A_ref, h0_ref, e_ref, w1_ref, b1_ref, w2_ref, b2_ref,
                      out_ref):
    L = e_ref.shape[0]
    A = A_ref[...]                      # (Np, Np) bf16, resident

    def layer(l, h):
        # GIN add-aggregation: self loops folded into A, per-destination edge
        # embeddings presummed into e.  bf16 x bf16 MXU, f32 accumulation.
        aggr = jnp.dot(A, h.astype(jnp.bfloat16),
                       preferred_element_type=jnp.float32)
        aggr = aggr + e_ref[l].astype(jnp.float32)

        # MLP: Linear(D -> 2D) -> ReLU -> Linear(2D -> D); BN folded into W2/b2.
        z1 = jnp.dot(aggr.astype(jnp.bfloat16), w1_ref[l],
                     preferred_element_type=jnp.float32) + b1_ref[l]
        z1 = jnp.maximum(z1, 0.0)
        z2 = jnp.dot(z1.astype(jnp.bfloat16), w2_ref[l],
                     preferred_element_type=jnp.float32) + b2_ref[l]

        # ReLU on every layer except the last (dropout with p=0 is identity).
        return jnp.where(l < L - 1, jnp.maximum(z2, 0.0), z2)

    out_ref[...] = lax.fori_loop(0, L, layer, h0_ref[...], unroll=True)


def gnn_stack_pallas(A_bf16, h0, e_sum, w1, b1, w2, b2):
    Np, Dp = h0.shape
    args = (A_bf16, h0, e_sum, w1, b1, w2, b2)
    resident = sum(int(np.prod(a.shape)) * a.dtype.itemsize for a in args)
    resident += Np * Dp * 4  # output block

    vspec = pl.BlockSpec(memory_space=pltpu.MemorySpace.VMEM)
    return pl.pallas_call(
        _gnn_stack_kernel,
        out_shape=jax.ShapeDtypeStruct((Np, Dp), jnp.float32),
        in_specs=[vspec] * 7,
        out_specs=vspec,
        compiler_params=pltpu.CompilerParams(
            vmem_limit_bytes=_vmem_limit_bytes(resident)),
    )(*args)


# ---------------------------------------------------------------------------
# Parameter initialization (deterministic, mirrors the module's __init__ shapes)
# ---------------------------------------------------------------------------
def _xavier_uniform(key, shape):
    fan_in, fan_out = shape
    bound = float(np.sqrt(6.0 / (fan_in + fan_out)))
    return jax.random.uniform(key, shape, jnp.float32, -bound, bound)


def init_params(key, num_layer, emb_dim):
    keys = jax.random.split(key, 2 + num_layer)
    x_emb1 = _xavier_uniform(keys[0], (NUM_ATOM_TYPE, emb_dim))
    x_emb2 = _xavier_uniform(keys[1], (NUM_CHIRALITY_TAG, emb_dim))
    layers = []
    for l in range(num_layer):
        ks = jax.random.split(keys[2 + l], 10)
        lim1 = 1.0 / float(np.sqrt(emb_dim))
        lim2 = 1.0 / float(np.sqrt(2 * emb_dim))
        layers.append(dict(
            e1=_xavier_uniform(ks[0], (NUM_BOND_TYPE, emb_dim)),
            e2=_xavier_uniform(ks[1], (NUM_BOND_DIRECTION, emb_dim)),
            w1=jax.random.uniform(ks[2], (emb_dim, 2 * emb_dim), jnp.float32, -lim1, lim1),
            b1=jax.random.uniform(ks[3], (1, 2 * emb_dim), jnp.float32, -lim1, lim1),
            w2=jax.random.uniform(ks[4], (2 * emb_dim, emb_dim), jnp.float32, -lim2, lim2),
            b2=jax.random.uniform(ks[5], (1, emb_dim), jnp.float32, -lim2, lim2),
            bn_w=jax.random.uniform(ks[6], (1, emb_dim), jnp.float32, 0.5, 1.5),
            bn_b=jax.random.uniform(ks[7], (1, emb_dim), jnp.float32, -0.5, 0.5),
            # running_mean is multiplied by the (zero) int64 scale buffer in
            # BatchNormFp32, so it does not affect the output.
            run_mean=jax.random.normal(ks[8], (1, emb_dim), jnp.float32),
            run_var=jax.random.uniform(ks[9], (1, emb_dim), jnp.float32, 0.5, 2.0),
        ))
    return x_emb1, x_emb2, layers


# ---------------------------------------------------------------------------
# Full GNN forward (tiny gathers / folds in JAX, fused layer stack in Pallas)
# ---------------------------------------------------------------------------
def gnn_forward(x, edge_index, edge_attr, x_emb1, x_emb2, layers,
                use_pallas=True):
    N = x.shape[0]
    D = x_emb1.shape[1]
    L = len(layers)

    # TODO(synk): embedding-table gathers and the edge scatter (segment_sum)
    # are tiny data-dependent gathers with no clean dense-Pallas equivalent;
    # they stay in plain JAX and feed the fused kernel.
    h0 = (jnp.take(x_emb1, x[:, 0], axis=0) +
          jnp.take(x_emb2, x[:, 1], axis=0)).astype(jnp.float32)

    # add self loops (GINConv.forward): self-loop attr = (4, 0)
    loop = jnp.arange(N, dtype=edge_index.dtype)
    ei = jnp.concatenate([edge_index, jnp.stack([loop, loop], axis=0)], axis=1)
    self_attr = jnp.zeros((N, 2), dtype=edge_attr.dtype).at[:, 0].set(4)
    ea = jnp.concatenate([edge_attr, self_attr], axis=0)
    src, dst = ei[0], ei[1]

    # dense adjacency for the x_j scatter-add: A[dst, src] += 1
    # (bf16 is exact for the small integer edge multiplicities of molecules)
    A = jnp.zeros((N, N), jnp.float32).at[dst, src].add(1.0)

    # per-layer pieces: summed edge embeddings + BN folded into the 2nd Linear
    e_sums, w1s, b1s, w2s, b2s = [], [], [], [], []
    for p in layers:
        edge_emb = (jnp.take(p['e1'], ea[:, 0], axis=0) +
                    jnp.take(p['e2'], ea[:, 1], axis=0))
        e_sums.append(jax.ops.segment_sum(edge_emb, dst, num_segments=N)
                      .astype(jnp.float32))
        # eval-mode BN: effective running mean is 0 (int64 zero scale buffer)
        scale = p['bn_w'] / jnp.sqrt(p['run_var'] + BN_EPS)
        w1s.append(p['w1'])
        b1s.append(p['b1'])
        w2s.append(p['w2'] * scale)
        b2s.append(p['b2'] * scale + p['bn_b'])

    if not use_pallas:   # pure-JAX f32 reference of the exact same math
        h = h0
        for l in range(L):
            aggr = A @ h + e_sums[l]
            z1 = jnp.maximum(aggr @ w1s[l] + b1s[l], 0.0)
            z2 = z1 @ w2s[l] + b2s[l]
            h = jnp.maximum(z2, 0.0) if l != L - 1 else z2
        return h

    # Pad to TPU-friendly shapes: feature axes AND the node axis -> multiples
    # of 128 (the node axis is A's lane dim and the aggregation's contraction
    # depth).  Zero padding is exact: padded feature columns stay zero through
    # every layer, and padded node rows never leak into real rows (their A
    # columns are zero); both are sliced off at the end.
    Np = _round_up(N, LANE)
    Dp = _round_up(D, LANE)
    D2p = _round_up(2 * D, LANE)

    def pad(a, shape):
        return jnp.pad(a, [(0, t - s) for s, t in zip(a.shape, shape)])

    A_p = pad(A, (Np, Np)).astype(jnp.bfloat16)
    h0_p = pad(h0, (Np, Dp))                                     # f32
    e_p = pad(jnp.stack(e_sums), (L, Np, Dp)).astype(jnp.bfloat16)
    w1_p = pad(jnp.stack(w1s), (L, Dp, D2p)).astype(jnp.bfloat16)
    b1_p = pad(jnp.stack(b1s), (L, 1, D2p))                      # f32
    w2_p = pad(jnp.stack(w2s), (L, D2p, Dp)).astype(jnp.bfloat16)
    b2_p = pad(jnp.stack(b2s), (L, 1, Dp))                       # f32

    # TODO(synk): for graphs beyond a few thousand nodes, switch to row-tiled A
    # (grid over Np/TN with h resident as the RHS) instead of fully-resident A.
    out = gnn_stack_pallas(A_p, h0_p, e_p, w1_p, b1_p, w2_p, b2_p)
    return out[:N, :D]


if __name__ == "__main__":
    key = jax.random.PRNGKey(0)
    N, E, emb_dim, num_layer = 16, 24, 32, 2

    k1, k2, k3, k4, k5, kp = jax.random.split(key, 6)
    x = jnp.stack([jax.random.randint(k1, (N,), 0, NUM_ATOM_TYPE),
                   jax.random.randint(k2, (N,), 0, NUM_CHIRALITY_TAG)], axis=1)
    edge_index = jax.random.randint(k3, (2, E), 0, N)
    edge_attr = jnp.stack([jax.random.randint(k4, (E,), 0, 4),  # 4 reserved for self loops
                           jax.random.randint(k5, (E,), 0, NUM_BOND_DIRECTION)], axis=1)

    x_emb1, x_emb2, layers = init_params(kp, num_layer, emb_dim)

    out = gnn_forward(x, edge_index, edge_attr, x_emb1, x_emb2, layers, use_pallas=True)
    out = jax.block_until_ready(out)

    ref = gnn_forward(x, edge_index, edge_attr, x_emb1, x_emb2, layers, use_pallas=False)
    ref = jax.block_until_ready(ref)

    assert out.shape == (N, emb_dim) and out.dtype == jnp.float32
    np.testing.assert_allclose(np.asarray(out), np.asarray(ref), rtol=5e-2, atol=5e-2)
    print("KERNEL_OK")
</pallas_src>

<mosaic_0001>
module attributes {stable_mosaic.version = 11 : i64} {
  func.func @_gnn_stack_kernel(%arg0: memref<128x128xbf16, #tpu.memory_space<vmem>>, %arg1: memref<128x128xf32, #tpu.memory_space<vmem>>, %arg2: memref<2x128x128xbf16, #tpu.memory_space<vmem>>, %arg3: memref<2x128x128xbf16, #tpu.memory_space<vmem>>, %arg4: memref<2x1x128xf32, #tpu.memory_space<vmem>>, %arg5: memref<2x128x128xbf16, #tpu.memory_space<vmem>>, %arg6: memref<2x1x128xf32, #tpu.memory_space<vmem>>, %arg7: memref<128x128xf32, #tpu.memory_space<vmem>>) attributes {dimension_semantics = [], scalar_prefetch = 0 : i64, scratch_operands = 0 : i64, tpu.core_type = #tpu.core_type<tc>} {
    %c0 = arith.constant 0 : index
    %c0_0 = arith.constant 0 : index
    %0 = vector.load %arg0[%c0, %c0_0] : memref<128x128xbf16, #tpu.memory_space<vmem>>, vector<128x128xbf16>
    %c0_1 = arith.constant 0 : index
    %c0_2 = arith.constant 0 : index
    %1 = vector.load %arg1[%c0_1, %c0_2] : memref<128x128xf32, #tpu.memory_space<vmem>>, vector<128x128xf32>
    %c0_i32 = arith.constant 0 : i32
    %2 = arith.truncf %1 : vector<128x128xf32> to vector<128x128xbf16>
    %cst = arith.constant dense<0.000000e+00> : vector<128x128xf32>
    %3 = tpu.matmul %0, %2, %cst {dimension_numbers = #tpu.dot_dimension_numbers<[1], [0], [0], [1], [0, 0, 1, 1], [], []>} : vector<128x128xbf16>, vector<128x128xbf16>, vector<128x128xf32> -> vector<128x128xf32>
    %4 = arith.index_cast %c0_i32 : i32 to index
    %c0_3 = arith.constant 0 : index
    %c0_4 = arith.constant 0 : index
    %5 = vector.load %arg2[%4, %c0_3, %c0_4] : memref<2x128x128xbf16, #tpu.memory_space<vmem>>, vector<1x128x128xbf16>
    %6 = vector.shape_cast %5 : vector<1x128x128xbf16> to vector<128x128xbf16>
    %7 = arith.extf %6 : vector<128x128xbf16> to vector<128x128xf32>
    %8 = arith.addf %3, %7 : vector<128x128xf32>
    %9 = arith.truncf %8 : vector<128x128xf32> to vector<128x128xbf16>
    %10 = arith.index_cast %c0_i32 : i32 to index
    %c0_5 = arith.constant 0 : index
    %c0_6 = arith.constant 0 : index
    %11 = vector.load %arg3[%10, %c0_5, %c0_6] : memref<2x128x128xbf16, #tpu.memory_space<vmem>>, vector<1x128x128xbf16>
    %12 = vector.shape_cast %11 : vector<1x128x128xbf16> to vector<128x128xbf16>
    %cst_7 = arith.constant dense<0.000000e+00> : vector<128x128xf32>
    %13 = tpu.matmul %9, %12, %cst_7 {dimension_numbers = #tpu.dot_dimension_numbers<[1], [0], [0], [1], [0, 0, 1, 1], [], []>} : vector<128x128xbf16>, vector<128x128xbf16>, vector<128x128xf32> -> vector<128x128xf32>
    %14 = arith.index_cast %c0_i32 : i32 to index
    %c0_8 = arith.constant 0 : index
    %c0_9 = arith.constant 0 : index
    %15 = vector.load %arg4[%14, %c0_8, %c0_9] : memref<2x1x128xf32, #tpu.memory_space<vmem>>, vector<1x1x128xf32>
    %16 = vector.shape_cast %15 : vector<1x1x128xf32> to vector<1x128xf32>
    %17 = vector.broadcast %16 : vector<1x128xf32> to vector<128x128xf32>
    %18 = arith.addf %13, %17 : vector<128x128xf32>
    %cst_10 = arith.constant 0.000000e+00 : f32
    %19 = vector.broadcast %cst_10 : f32 to vector<128x128xf32>
    %20 = arith.maximumf %18, %19 : vector<128x128xf32>
    %21 = arith.truncf %20 : vector<128x128xf32> to vector<128x128xbf16>
    %22 = arith.index_cast %c0_i32 : i32 to index
    %c0_11 = arith.constant 0 : index
    %c0_12 = arith.constant 0 : index
    %23 = vector.load %arg5[%22, %c0_11, %c0_12] : memref<2x128x128xbf16, #tpu.memory_space<vmem>>, vector<1x128x128xbf16>
    %24 = vector.shape_cast %23 : vector<1x128x128xbf16> to vector<128x128xbf16>
    %cst_13 = arith.constant dense<0.000000e+00> : vector<128x128xf32>
    %25 = tpu.matmul %21, %24, %cst_13 {dimension_numbers = #tpu.dot_dimension_numbers<[1], [0], [0], [1], [0, 0, 1, 1], [], []>} : vector<128x128xbf16>, vector<128x128xbf16>, vector<128x128xf32> -> vector<128x128xf32>
    %26 = arith.index_cast %c0_i32 : i32 to index
    %c0_14 = arith.constant 0 : index
    %c0_15 = arith.constant 0 : index
    %27 = vector.load %arg6[%26, %c0_14, %c0_15] : memref<2x1x128xf32, #tpu.memory_space<vmem>>, vector<1x1x128xf32>
    %28 = vector.shape_cast %27 : vector<1x1x128xf32> to vector<1x128xf32>
    %29 = vector.broadcast %28 : vector<1x128xf32> to vector<128x128xf32>
    %30 = arith.addf %25, %29 : vector<128x128xf32>
    %c1_i32 = arith.constant 1 : i32
    %31 = arith.cmpi slt, %c0_i32, %c1_i32 : i32
    %cst_16 = arith.constant 0.000000e+00 : f32
    %32 = vector.broadcast %cst_16 : f32 to vector<128x128xf32>
    %33 = arith.maximumf %30, %32 : vector<128x128xf32>
    %34 = arith.select %31, %33, %30 : vector<128x128xf32>
    %c1_i32_17 = arith.constant 1 : i32
    %35 = arith.truncf %34 : vector<128x128xf32> to vector<128x128xbf16>
    %cst_18 = arith.constant dense<0.000000e+00> : vector<128x128xf32>
    %36 = tpu.matmul %0, %35, %cst_18 {dimension_numbers = #tpu.dot_dimension_numbers<[1], [0], [0], [1], [0, 0, 1, 1], [], []>} : vector<128x128xbf16>, vector<128x128xbf16>, vector<128x128xf32> -> vector<128x128xf32>
    %37 = arith.index_cast %c1_i32_17 : i32 to index
    %c0_19 = arith.constant 0 : index
    %c0_20 = arith.constant 0 : index
    %38 = vector.load %arg2[%37, %c0_19, %c0_20] : memref<2x128x128xbf16, #tpu.memory_space<vmem>>, vector<1x128x128xbf16>
    %39 = vector.shape_cast %38 : vector<1x128x128xbf16> to vector<128x128xbf16>
    %40 = arith.extf %39 : vector<128x128xbf16> to vector<128x128xf32>
    %41 = arith.addf %36, %40 : vector<128x128xf32>
    %42 = arith.truncf %41 : vector<128x128xf32> to vector<128x128xbf16>
    %43 = arith.index_cast %c1_i32_17 : i32 to index
    %c0_21 = arith.constant 0 : index
    %c0_22 = arith.constant 0 : index
    %44 = vector.load %arg3[%43, %c0_21, %c0_22] : memref<2x128x128xbf16, #tpu.memory_space<vmem>>, vector<1x128x128xbf16>
    %45 = vector.shape_cast %44 : vector<1x128x128xbf16> to vector<128x128xbf16>
    %cst_23 = arith.constant dense<0.000000e+00> : vector<128x128xf32>
    %46 = tpu.matmul %42, %45, %cst_23 {dimension_numbers = #tpu.dot_dimension_numbers<[1], [0], [0], [1], [0, 0, 1, 1], [], []>} : vector<128x128xbf16>, vector<128x128xbf16>, vector<128x128xf32> -> vector<128x128xf32>
    %47 = arith.index_cast %c1_i32_17 : i32 to index
    %c0_24 = arith.constant 0 : index
    %c0_25 = arith.constant 0 : index
    %48 = vector.load %arg4[%47, %c0_24, %c0_25] : memref<2x1x128xf32, #tpu.memory_space<vmem>>, vector<1x1x128xf32>
    %49 = vector.shape_cast %48 : vector<1x1x128xf32> to vector<1x128xf32>
    %50 = vector.broadcast %49 : vector<1x128xf32> to vector<128x128xf32>
    %51 = arith.addf %46, %50 : vector<128x128xf32>
    %cst_26 = arith.constant 0.000000e+00 : f32
    %52 = vector.broadcast %cst_26 : f32 to vector<128x128xf32>
    %53 = arith.maximumf %51, %52 : vector<128x128xf32>
    %54 = arith.truncf %53 : vector<128x128xf32> to vector<128x128xbf16>
    %55 = arith.index_cast %c1_i32_17 : i32 to index
    %c0_27 = arith.constant 0 : index
    %c0_28 = arith.constant 0 : index
    %56 = vector.load %arg5[%55, %c0_27, %c0_28] : memref<2x128x128xbf16, #tpu.memory_space<vmem>>, vector<1x128x128xbf16>
    %57 = vector.shape_cast %56 : vector<1x128x128xbf16> to vector<128x128xbf16>
    %cst_29 = arith.constant dense<0.000000e+00> : vector<128x128xf32>
    %58 = tpu.matmul %54, %57, %cst_29 {dimension_numbers = #tpu.dot_dimension_numbers<[1], [0], [0], [1], [0, 0, 1, 1], [], []>} : vector<128x128xbf16>, vector<128x128xbf16>, vector<128x128xf32> -> vector<128x128xf32>
    %59 = arith.index_cast %c1_i32_17 : i32 to index
    %c0_30 = arith.constant 0 : index
    %c0_31 = arith.constant 0 : index
    %60 = vector.load %arg6[%59, %c0_30, %c0_31] : memref<2x1x128xf32, #tpu.memory_space<vmem>>, vector<1x1x128xf32>
    %61 = vector.shape_cast %60 : vector<1x1x128xf32> to vector<1x128xf32>
    %62 = vector.broadcast %61 : vector<1x128xf32> to vector<128x128xf32>
    %63 = arith.addf %58, %62 : vector<128x128xf32>
    %c1_i32_32 = arith.constant 1 : i32
    %64 = arith.cmpi slt, %c1_i32_17, %c1_i32_32 : i32
    %cst_33 = arith.constant 0.000000e+00 : f32
    %65 = vector.broadcast %cst_33 : f32 to vector<128x128xf32>
    %66 = arith.maximumf %63, %65 : vector<128x128xf32>
    %67 = arith.select %64, %66, %63 : vector<128x128xf32>
    %c2_i32 = arith.constant 2 : i32
    %c0_34 = arith.constant 0 : index
    %c0_35 = arith.constant 0 : index
    %68 = vector.load %arg7[%c0_34, %c0_35] : memref<128x128xf32, #tpu.memory_space<vmem>>, vector<128x128xf32>
    tpu.vector_store %arg7[%c0_34, %c0_35], %67 {strides = array<i32>} : memref<128x128xf32, #tpu.memory_space<vmem>>, vector<128x128xf32>,
    return
  }
}

</mosaic_0001>

<bundles_post_ra>
// kernel: tpu_custom_call.1
= control target key start
LH: loop header
LB: loop body
LE: loop exit
PB: predicated region body
PF: predicated region fallthrough
CT: control target
= control target key end

     0   :  { %12 = vsyncpa [#allocation3], 0  ;;  %s2028_s0 = inlined_call_operand.hbm [shape: bf16[128,128], index: 0, kind: input, shape index: {}]   ;;  %s2029_s1 = inlined_call_operand.hbm [shape: f32[128,128], index: 1, kind: input, shape index: {}]   ;;  %s2030_s2 = inlined_call_operand.hbm [shape: bf16[2,128,128], index: 2, kind: input, shape index: {}]   ;;  %s2031_s3 = inlined_call_operand.hbm [shape: bf16[2,128,128], index: 3, kind: input, shape index: {}]   ;;  %s2032_s4 = inlined_call_operand.vmem [shape: f32[2,1,128], index: 4, kind: input, shape index: {}]   ;;  %s2033_s5 = inlined_call_operand.hbm [shape: bf16[2,128,128], index: 5, kind: input, shape index: {}]   ;;  %s2034_s6 = inlined_call_operand.vmem [shape: f32[2,1,128], index: 6, kind: input, shape index: {}]   ;;  %s2035_s7 = inlined_call_operand.hbm [shape: f32[128,128], index: 7, kind: output, shape index: {}]  }
   0x1   :  { %13 = vsyncpa [#allocation6], 0 }
   0x2   :  { %14 = vsyncpa [#allocation9], 0 }
   0x3   :  { %15 = vsyncpa [#allocation4], 0  ;;  %s1844_s24 = smov [#allocation5]   ;;  %s1704_s28 = scalar_lea.hbm %s2029_s1, 2048 }
   0x4   :  { %s33_s25 = sshll.u32 %s1844_s24, 4  ;;  %p1705_p0 = scmp.ne.s32.totalorder %s2029_s1, %s1704_s28  ;;  %s34_s25 = int_to_ptr.vmem [resolvable:$true] %s33_s25 }
   0x5   :  { %p1708_p1 = scmp.lt.u32.totalorder %s1704_s28, %s2029_s1 }
   0x7   :  { %p1710_p2 = pnand %p1708_p1, %p1705_p0 }
   0x9   :  { %1713 = shalt.err (!%p1710_p2)
}
   0xa   :  { %s1714_s10 = scalar_lea.vmem %s34_s25, 2048  ;;  %p1719_p4 = scmp.lt.s32.totalorder %s34_s25, %s34_s25 }
   0xb   :  { %p1715_p3 = scmp.ne.s32.totalorder %s34_s25, %s1714_s10  ;;  %p1720_p5 = scmp.lt.s32.totalorder %s1714_s10, %s1714_s10 }
   0xd   :  { %p1721_p6 = por %p1720_p5, %p1719_p4 }
   0xf   :  { %p1722_p7 = pnand %p1721_p6, %p1715_p3 }
  0x11   :  { %1725 = shalt.err (!%p1722_p7)
}
  0x12   :  { %s1845_s11 = smov 128   ;;  %s1846_s12 = smov 8  }
  0x13   :  { %39 = dma.hbm_to_vmem [thread:$0]  %s2029_s1, 2048, %s34_s25, [#allocation6], %s1845_s11, %s1845_s11, %s1846_s12  }
  0x14   :  { %s1847_s15 = smov [#allocation8]   ;;  %s1848_s17 = smov [#allocation2]  }
  0x15   :  { %s57_s16 = sshll.u32 %s1847_s15, 4  ;;  %s21_s18 = sshll.u32 %s1848_s17, 4  ;;  %s58_s16 = int_to_ptr.vmem [resolvable:$true] %s57_s16  ;;  %s22_s18 = int_to_ptr.vmem [resolvable:$true] %s21_s18 }
  0x16   :  { %s1726_s21 = scalar_lea.hbm %s2031_s3, 2048 }
  0x17   :  { %p1727_p8 = scmp.ne.s32.totalorder %s2031_s3, %s1726_s21  ;;  %p1730_p9 = scmp.lt.u32.totalorder %s1726_s21, %s2031_s3 }
  0x19   :  { %p1732_p10 = pnand %p1730_p9, %p1727_p8 }
  0x1b   :  { %1735 = shalt.err (!%p1732_p10)
}
  0x1c   :  { %s1736_s1 = scalar_lea.vmem %s58_s16, 2048  ;;  %p1741_p12 = scmp.lt.s32.totalorder %s58_s16, %s58_s16 }
  0x1d   :  { %p1737_p11 = scmp.ne.s32.totalorder %s58_s16, %s1736_s1  ;;  %p1742_p13 = scmp.lt.s32.totalorder %s1736_s1, %s1736_s1 }
  0x1f   :  { %p1743_p0 = por %p1742_p13, %p1741_p12 }
  0x21   :  { %p1744_p1 = pnand %p1743_p0, %p1737_p11 }
  0x23   :  { %1747 = shalt.err (!%p1744_p1)
}
  0x24   :  { %s1849_s25 = smov 64   ;;  %s1850_s27 = smov 4  }
  0x25   :  { %63 = dma.hbm_to_vmem [thread:$0]  %s2031_s3, 2048, %s58_s16, [#allocation9], %s1849_s25, %s1849_s25, %s1850_s27  }
  0x26   :  { %s1748_s9 = scalar_lea.hbm %s2028_s0, 1024 }
  0x27   :  { %p1749_p2 = scmp.ne.s32.totalorder %s2028_s0, %s1748_s9  ;;  %p1752_p3 = scmp.lt.u32.totalorder %s1748_s9, %s2028_s0 }
  0x29   :  { %p1754_p4 = pnand %p1752_p3, %p1749_p2 }
  0x2b   :  { %1757 = shalt.err (!%p1754_p4)
}
  0x2c   :  { %s1758_s17 = scalar_lea.vmem %s22_s18, 1024  ;;  %p1763_p6 = scmp.lt.s32.totalorder %s22_s18, %s22_s18 }
  0x2d   :  { %p1759_p5 = scmp.ne.s32.totalorder %s22_s18, %s1758_s17  ;;  %p1764_p7 = scmp.lt.s32.totalorder %s1758_s17, %s1758_s17 }
  0x2f   :  { %p1765_p8 = por %p1764_p7, %p1763_p6 }
  0x31   :  { %p1766_p9 = pnand %p1765_p8, %p1759_p5 }
  0x33   :  { %1769 = shalt.err (!%p1766_p9)
}
  0x34   :  { %27 = dma.hbm_to_vmem [thread:$0]  %s2028_s0, 1024, %s22_s18, [#allocation3], %s1849_s25, %s1849_s25, %s1850_s27  }
  0x35   :  { %s1851_s19 = smov [#allocation7]   ;;  %s1852_s21 = smov [#allocation10]  }
  0x36   :  { %s45_s20 = sshll.u32 %s1851_s19, 4  ;;  %s71_s22 = sshll.u32 %s1852_s21, 4  ;;  %s46_s20 = int_to_ptr.vmem [resolvable:$true] %s45_s20  ;;  %s72_s22 = int_to_ptr.vmem [resolvable:$true] %s71_s22 }
  0x37   :  { %s1770_s26 = scalar_lea.hbm %s2030_s2, 2048 }
  0x38   :  { %p1771_p10 = scmp.ne.s32.totalorder %s2030_s2, %s1770_s26  ;;  %p1774_p11 = scmp.lt.u32.totalorder %s1770_s26, %s2030_s2 }
  0x3a   :  { %p1776_p12 = pnand %p1774_p11, %p1771_p10 }
  0x3c   :  { %1779 = shalt.err (!%p1776_p12)
}
  0x3d   :  { %s1780_s0 = scalar_lea.vmem %s46_s20, 2048  ;;  %p1785_p0 = scmp.lt.s32.totalorder %s46_s20, %s46_s20 }
  0x3e   :  { %p1781_p13 = scmp.ne.s32.totalorder %s46_s20, %s1780_s0  ;;  %p1786_p1 = scmp.lt.s32.totalorder %s1780_s0, %s1780_s0 }
  0x40   :  { %p1787_p2 = por %p1786_p1, %p1785_p0 }
  0x42   :  { %p1788_p3 = pnand %p1787_p2, %p1781_p13 }
  0x44   :  { %1791 = shalt.err (!%p1788_p3)
}
  0x45   :  { %51 = dma.hbm_to_vmem [thread:$0]  %s2030_s2, 2048, %s46_s20, [#allocation6], %s1849_s25, %s1849_s25, %s1850_s27  }
  0x46   :  { %s1792_s13 = scalar_lea.hbm %s2033_s5, 2048 }
  0x47   :  { %p1793_p4 = scmp.ne.s32.totalorder %s2033_s5, %s1792_s13  ;;  %p1796_p5 = scmp.lt.u32.totalorder %s1792_s13, %s2033_s5 }
  0x49   :  { %p1798_p6 = pnand %p1796_p5, %p1793_p4 }
  0x4b   :  { %1801 = shalt.err (!%p1798_p6)
}
  0x4c   :  { %s1802_s16 = scalar_lea.vmem %s72_s22, 2048  ;;  %p1807_p8 = scmp.lt.s32.totalorder %s72_s22, %s72_s22 }
  0x4d   :  { %p1803_p7 = scmp.ne.s32.totalorder %s72_s22, %s1802_s16  ;;  %p1808_p9 = scmp.lt.s32.totalorder %s1802_s16, %s1802_s16 }
  0x4f   :  { %p1809_p10 = por %p1808_p9, %p1807_p8 }
  0x51   :  { %p1810_p11 = pnand %p1809_p10, %p1803_p7 }
  0x53   :  { %1813 = shalt.err (!%p1810_p11)
}
  0x54   :  { %77 = dma.hbm_to_vmem [thread:$0]  %s2033_s5, 2048, %s72_s22, [#allocation9], %s1849_s25, %s1849_s25, %s1850_s27  }
  0x55   :  { %1836 = dma.done.wait [#allocation3], 1024  }
  0x56   :  { %1837 = vsyncadd [#allocation3], 4294966272 }
  0x57   :  { %1838 = dma.done.wait [#allocation6], 4096  }
  0x58   :  { %1839 = vsyncadd [#allocation6], 4294963200 }
  0x59   :  { %1840 = dma.done.wait [#allocation9], 4096  }
  0x5a   :  { %1841 = vsyncadd [#allocation9], 4294963200  ;;  %v112_v0 = vld [vmem:[#allocation5] sm:$0xff]  ;;  %v113_v1 = vld [vmem:[#allocation5 + $0x8] sm:$0xff] }
  0x5b   :  { %v114_v2 = vld [vmem:[#allocation5 + $0x10] sm:$0xff]  ;;  %v128_v3 = vpack.c.bf16 %v113_v1, %v112_v0  ;;  %v115_v4 = vld [vmem:[#allocation5 + $0x18] sm:$0xff]  ;;  %v116_v6 = vld [vmem:[#allocation5 + $0x20] sm:$0xff] }
  0x5c   :  { %v129_v5 = vpack.c.bf16 %v115_v4, %v114_v2  ;;  %v117_v7 = vld [vmem:[#allocation5 + $0x28] sm:$0xff]  ;;  %v118_v8 = vld [vmem:[#allocation5 + $0x30] sm:$0xff]  ;;  %v119_v10 = vld [vmem:[#allocation5 + $0x38] sm:$0xff] }
  0x5d   :  { %1462 = vmatprep.subr.bf16.mxu0 %v128_v3  ;;  %v130_v9 = vpack.c.bf16 %v117_v7, %v116_v6  ;;  %v1969_v11 = vld [vmem:[#allocation2] sm:$0xff]   ;;  %v131_v12 = vpack.c.bf16 %v119_v10, %v118_v8  ;;  %v121_v14 = vld [vmem:[#allocation5 + $0x48] sm:$0xff]  ;;  %v122_v15 = vld [vmem:[#allocation5 + $0x50] sm:$0xff] }
  0x5e   :  { %1463 = vmatpush3.bf16.msra.mxu0 %v128_v3  ;;  %1478 = vmatprep.mubr.bf16.mxu0 %v1969_v11  ;;  %v120_v13 = vld [vmem:[#allocation5 + $0x40] sm:$0xff]  ;;  %v123_v17 = vld [vmem:[#allocation5 + $0x58] sm:$0xff]  ;;  %v1673_v19 = vld [vmem:[#allocation8 + $0x8] sm:$0xff]  }
  0x5f   :  { %1464 = vmatprep.subr.bf16.mxu0 %v129_v5  ;;  %v132_v16 = vpack.c.bf16 %v121_v14, %v120_v13  ;;  %v1672_v18 = vld [vmem:[#allocation8] sm:$0xff]   ;;  %v133_v21 = vpack.c.bf16 %v123_v17, %v122_v15  ;;  %v125_v22 = vld [vmem:[#allocation5 + $0x68] sm:$0xff]  ;;  %v1674_v23 = vld [vmem:[#allocation8 + $0x10] sm:$0xff]  }
  0x60   :  { %v124_v20 = vld [vmem:[#allocation5 + $0x60] sm:$0xff]  ;;  %1494 = vmatprep.subr.bf16.mxu1 %v1672_v18  ;;  %v126_v24 = vld [vmem:[#allocation5 + $0x70] sm:$0xff]  ;;  %v127_v25 = vld [vmem:[#allocation5 + $0x78] sm:$0xff] }
  0x61   :  { %1495 = vmatpush3.bf16.msra.mxu1 %v1672_v18  ;;  %v1675_v26 = vld [vmem:[#allocation8 + $0x18] sm:$0xff]   ;;  %v134_v27 = vpack.c.bf16 %v125_v22, %v124_v20  ;;  %v1676_v28 = vld [vmem:[#allocation8 + $0x20] sm:$0xff]   ;;  %v135_v29 = vpack.c.bf16 %v127_v25, %v126_v24  ;;  %v1677_v30 = vld [vmem:[#allocation8 + $0x28] sm:$0xff]  }
  0x62   :  { %1465 = vmatpush3.bf16.msra.mxu0 %v129_v5  ;;  %1496 = vmatprep.subr.bf16.mxu1 %v1673_v19  ;;  %v1972_v31 = vld [vmem:[#allocation2 + $0x8] sm:$0xff]   ;;  %v1974_v32 = vld [vmem:[#allocation2 + $0x10] sm:$0xff]   ;;  %v1978_v33 = vld [vmem:[#allocation2 + $0x18] sm:$0xff]  }
  0x63   :  { %1466 = vmatprep.subr.bf16.mxu0 %v130_v9  ;;  %v1980_v34 = vld [vmem:[#allocation2 + $0x20] sm:$0xff]   ;;  %v1984_v35 = vld [vmem:[#allocation2 + $0x28] sm:$0xff]   ;;  %v1986_v36 = vld [vmem:[#allocation2 + $0x30] sm:$0xff]  }
  0x64   :  { %v1990_v37 = vld [vmem:[#allocation2 + $0x38] sm:$0xff]   ;;  %v1678_v38 = vld [vmem:[#allocation8 + $0x30] sm:$0xff]   ;;  %v1680_v40 = vld [vmem:[#allocation10] sm:$0xff]  }
  0x65   :  { %1497 = vmatpush3.bf16.msra.mxu1 %v1673_v19  ;;  %v1679_v39 = vld [vmem:[#allocation8 + $0x38] sm:$0xff]   ;;  %v1681_v41 = vld [vmem:[#allocation10 + $0x8] sm:$0xff]   ;;  %v1682_v42 = vld [vmem:[#allocation10 + $0x10] sm:$0xff]  }
  0x66   :  { %1467 = vmatpush3.bf16.msra.mxu0 %v130_v9  ;;  %1498 = vmatprep.subr.bf16.mxu1 %v1674_v23  ;;  %v1683_v43 = vld [vmem:[#allocation10 + $0x18] sm:$0xff]   ;;  %v1684_v44 = vld [vmem:[#allocation10 + $0x20] sm:$0xff]   ;;  %v1685_v45 = vld [vmem:[#allocation10 + $0x28] sm:$0xff]  }
  0x67   :  { %1468 = vmatprep.subr.bf16.mxu0 %v131_v12  ;;  %v1352_v46 = vld [vmem:[#allocation7 + $0x8] sm:$0xff]   ;;  %v1289_v47 = vld [vmem:[#allocation7] sm:$0xff]   ;;  %v1354_v60 = vld [vmem:[#allocation7 + $0x18] sm:$0xff]  }
  0x68   :  { %v1294_v48 = vunpack.c.l.bf16 %v1352_v46  ;;  %v1295_v49 = vunpack.c.h.bf16 %v1352_v46  ;;  %v1290_v51 = vunpack.c.l.bf16 %v1289_v47  ;;  %v1291_v52 = vunpack.c.h.bf16 %v1289_v47  ;;  %v1353_v62 = vld [vmem:[#allocation7 + $0x10] sm:$0xff]   ;;  %v1356_v13 = vld [vmem:[#allocation7 + $0x28] sm:$0xff]   ;;  %v1355_v15 = vld [vmem:[#allocation7 + $0x20] sm:$0xff]  }
  0x69   :  { %1499 = vmatpush3.bf16.msra.mxu1 %v1674_v23  ;;  %v1302_v0 = vunpack.c.l.bf16 %v1354_v60  ;;  %v1303_v1 = vunpack.c.h.bf16 %v1354_v60  ;;  %v1298_v3 = vunpack.c.l.bf16 %v1353_v62  ;;  %v1299_v4 = vunpack.c.h.bf16 %v1353_v62 }
  0x6a   :  { %1469 = vmatpush3.bf16.msra.mxu0 %v131_v12  ;;  %1500 = vmatprep.subr.bf16.mxu1 %v1675_v26  ;;  %v1310_v17 = vunpack.c.l.bf16 %v1356_v13  ;;  %v1311_v18 = vunpack.c.h.bf16 %v1356_v13  ;;  %v1306_v20 = vunpack.c.l.bf16 %v1355_v15 }
  0x6b   :  { %1470 = vmatprep.subr.bf16.mxu0 %v132_v16 }
  0x6d   :  { %1501 = vmatpush3.bf16.msra.mxu1 %v1675_v26 }
  0x6e   :  { %1471 = vmatpush3.bf16.msra.mxu0 %v132_v16  ;;  %1502 = vmatprep.subr.bf16.mxu1 %v1676_v28 }
  0x6f   :  { %1472 = vmatprep.subr.bf16.mxu0 %v133_v21 }
  0x71   :  { %1503 = vmatpush3.bf16.msra.mxu1 %v1676_v28 }
  0x72   :  { %1473 = vmatpush3.bf16.msra.mxu0 %v133_v21  ;;  %1504 = vmatprep.subr.bf16.mxu1 %v1677_v30  ;;  %v1307_v21 = vunpack.c.h.bf16 %v1355_v15 }
  0x73   :  { %1474 = vmatprep.subr.bf16.mxu0 %v134_v27 }
  0x75   :  { %1505 = vmatpush3.bf16.msra.mxu1 %v1677_v30 }
  0x76   :  { %1475 = vmatpush3.bf16.msra.mxu0 %v134_v27  ;;  %1506 = vmatprep.subr.bf16.mxu1 %v1678_v38 }
  0x77   :  { %1476 = vmatprep.subr.bf16.mxu0 %v135_v29 }
  0x79   :  { %1507 = vmatpush3.bf16.msra.mxu1 %v1678_v38  ;;  %v1357_v38 = vld [vmem:[#allocation7 + $0x30] sm:$0xff]  }
  0x7a   :  { %1477 = vmatpush3.bf16.msra.mxu0 %v135_v29  ;;  %1508 = vmatprep.subr.bf16.mxu1 %v1679_v39  ;;  %v1358_v29 = vld [vmem:[#allocation7 + $0x38] sm:$0xff]  }
  0x7b   :  { %1526 = vmatprep.subr.bf16.mxu0 %v1680_v40 }
  0x7d   :  { %1479 = vmatmul.mubr.bf16.vlgmr.msra.gmra.mrb[0].mxu0 %v1972_v31  ;;  %1509 = vmatpush3.bf16.msra.mxu1 %v1679_v39 }
  0x7e   :  { %1482 = vmatprep.mubr.bf16.mxu0 %v1974_v32  ;;  %1527 = vmatpush3.bf16.msra.mxu0 %v1680_v40  ;;  %v1318_v40 = vunpack.c.l.bf16 %v1358_v29 }
  0x7f   :  { %1528 = vmatprep.subr.bf16.mxu0 %v1681_v41 }
  0x82   :  { %1529 = vmatpush3.bf16.msra.mxu0 %v1681_v41  ;;  %v1319_v41 = vunpack.c.h.bf16 %v1358_v29 }
  0x83   :  { %1530 = vmatprep.subr.bf16.mxu0 %v1682_v42 }
  0x85   :  { %1483 = vmatmul.mubr.bf16.gmra.mrb[4].mxu0 %v1978_v33 }
  0x86   :  { %1486 = vmatprep.mubr.bf16.mxu0 %v1980_v34  ;;  %1531 = vmatpush3.bf16.msra.mxu0 %v1682_v42 }
  0x87   :  { %1532 = vmatprep.subr.bf16.mxu0 %v1683_v43 }
  0x8a   :  { %1533 = vmatpush3.bf16.msra.mxu0 %v1683_v43  ;;  %v1314_v43 = vunpack.c.l.bf16 %v1357_v38 }
  0x8b   :  { %1534 = vmatprep.subr.bf16.mxu0 %v1684_v44 }
  0x8d   :  { %1487 = vmatmul.mubr.bf16.gmra.mrb[8].mxu0 %v1984_v35 }
  0x8e   :  { %1490 = vmatprep.mubr.bf16.mxu0 %v1986_v36  ;;  %1535 = vmatpush3.bf16.msra.mxu0 %v1684_v44  ;;  %v1315_v44 = vunpack.c.h.bf16 %v1357_v38 }
  0x8f   :  { %1536 = vmatprep.subr.bf16.mxu0 %v1685_v45 }
  0x92   :  { %1537 = vmatpush3.bf16.msra.mxu0 %v1685_v45 }
  0x95   :  { %1491 = vmatmul.mubr.bf16.gmra.mrb[12].mxu0 %v1990_v37 }
 0x150   :  { %v1480_v50 = vpop.f32.mrb[0].mxu0 }
 0x151   :  { %v250_v53 = vpop.f32.mrb[1].mxu0  ;;  %v259_v55 = vadd.f32 %v1480_v50, %v1294_v48 }
 0x152   :  { %v1481_v54 = vpop.f32.mrb[2].mxu0  ;;  %v251_v58 = vadd.f32 %v1290_v51, %v250_v53 }
 0x153   :  { %v262_v56 = vadd.f32 %v1481_v54, %v1295_v49  ;;  %v253_v57 = vpop.f32.mrb[3].mxu0  ;;  %v1686_v54 = vld [vmem:[#allocation10 + $0x30] sm:$0xff]  }
 0x154   :  { %v254_v59 = vadd.f32 %v1291_v52, %v253_v57  ;;  %1538 = vmatprep.subr.bf16.mxu0 %v1686_v54 }
 0x155   :  { %v314_v61 = vpack.c.bf16 %v262_v56, %v259_v55  ;;  %1539 = vmatpush3.bf16.msra.mxu0 %v1686_v54  ;;  %v1687_v55 = vld [vmem:[#allocation10 + $0x38] sm:$0xff]   ;;  %v1250_v56 = vld [vmem:[%s2032_s4] ss:$0 sm:$0xff] }
 0x156   :  { %v313_v63 = vpack.c.bf16 %v254_v59, %v251_v58  ;;  %1540 = vmatprep.subr.bf16.mxu0 %v1687_v55 }
 0x158   :  { %v1484_v2 = vpop.f32.mrb[4].mxu0  ;;  %1510 = vmatprep.mubr.bf16.mxu1 %v313_v63 }
 0x159   :  { %v266_v5 = vpop.f32.mrb[5].mxu0  ;;  %1511 = vmatmul.mubr.bf16.vlgmr.msra.gmra.mrb[0].mxu1 %v314_v61  ;;  %v275_v7 = vadd.f32 %v1484_v2, %v1302_v0  ;;  %1541 = vmatpush3.bf16.msra.mxu0 %v1687_v55 }
 0x15a   :  { %v1485_v6 = vpop.f32.mrb[6].mxu0  ;;  %v267_v10 = vadd.f32 %v1298_v3, %v266_v5 }
 0x15b   :  { %v278_v8 = vadd.f32 %v1485_v6, %v1303_v1  ;;  %v269_v9 = vpop.f32.mrb[7].mxu0 }
 0x15c   :  { %v270_v12 = vadd.f32 %v1299_v4, %v269_v9 }
 0x15d   :  { %v316_v14 = vpack.c.bf16 %v278_v8, %v275_v7 }
 0x15e   :  { %v315_v16 = vpack.c.bf16 %v270_v12, %v267_v10 }
 0x160   :  { %v1488_v19 = vpop.f32.mrb[8].mxu0  ;;  %1514 = vmatprep.mubr.bf16.mxu1 %v315_v16 }
 0x161   :  { %v282_v22 = vpop.f32.mrb[9].mxu0  ;;  %1515 = vmatmul.mubr.bf16.gmra.mrb[4].mxu1 %v316_v14  ;;  %v291_v24 = vadd.f32 %v1488_v19, %v1310_v17 }
 0x162   :  { %v1489_v23 = vpop.f32.mrb[10].mxu0  ;;  %v283_v27 = vadd.f32 %v1306_v20, %v282_v22 }
 0x163   :  { %v294_v25 = vadd.f32 %v1489_v23, %v1311_v18  ;;  %v285_v26 = vpop.f32.mrb[11].mxu0 }
 0x164   :  { %v286_v28 = vadd.f32 %v1307_v21, %v285_v26 }
 0x165   :  { %v318_v30 = vpack.c.bf16 %v294_v25, %v291_v24 }
 0x166   :  { %v317_v39 = vpack.c.bf16 %v286_v28, %v283_v27 }
 0x168   :  { %v1492_v42 = vpop.f32.mrb[12].mxu0  ;;  %1518 = vmatprep.mubr.bf16.mxu1 %v317_v39 }
 0x169   :  { %v298_v45 = vpop.f32.mrb[13].mxu0  ;;  %1519 = vmatmul.mubr.bf16.gmra.mrb[8].mxu1 %v318_v30  ;;  %v307_v47 = vadd.f32 %v1492_v42, %v1318_v40 }
 0x16a   :  { %v1493_v46 = vpop.f32.mrb[14].mxu0  ;;  %v299_v50 = vadd.f32 %v1314_v43, %v298_v45 }
 0x16b   :  { %v310_v48 = vadd.f32 %v1493_v46, %v1319_v41  ;;  %v301_v49 = vpop.f32.mrb[15].mxu0 }
 0x16c   :  { %v302_v51 = vadd.f32 %v1315_v44, %v301_v49 }
 0x16d   :  { %v320_v52 = vpack.c.bf16 %v310_v48, %v307_v47 }
 0x16e   :  { %v319_v53 = vpack.c.bf16 %v302_v51, %v299_v50 }
 0x170   :  { %1522 = vmatprep.mubr.bf16.mxu1 %v319_v53 }
 0x171   :  { %1523 = vmatmul.mubr.bf16.gmra.mrb[12].mxu1 %v320_v52 }
 0x172   :  { %1574 = vmatprep.mubr.bf16.mxu1 %v1969_v11 }
 0x22c   :  { %v1512_v57 = vpop.f32.mrb[0].mxu1 }
 0x22d   :  { %v435_v58 = vadd.f32 %v1512_v57, %v1250_v56  ;;  %v426_v59 = vpop.f32.mrb[1].mxu1  ;;  %v1688_v57 = vld [vmem:[#allocation8 + $0x40] sm:$0xff]  }
 0x22e   :  { %v427_v60 = vadd.f32 %v1250_v56, %v426_v59  ;;  %v1513_v61 = vpop.f32.mrb[2].mxu1  ;;  %1590 = vmatprep.subr.bf16.mxu0 %v1688_v57  ;;  %v1690_v59 = vld [vmem:[#allocation8 + $0x50] sm:$0xff]  }
 0x22f   :  { %v438_v62 = vadd.f32 %v1513_v61, %v1250_v56  ;;  %v429_v63 = vpop.f32.mrb[3].mxu1  ;;  %v491_v1 = vmax.f32 %v435_v58, 0.0  ;;  %v1689_v58 = vld [vmem:[#allocation8 + $0x48] sm:$0xff]  }
 0x230   :  { %v430_v0 = vadd.f32 %v1250_v56, %v429_v63  ;;  %v489_v2 = vmax.f32 %v427_v60, 0.0  ;;  %v1691_v60 = vld [vmem:[#allocation8 + $0x58] sm:$0xff]   ;;  %v1693_v61 = vld [vmem:[#allocation8 + $0x68] sm:$0xff]  }
 0x231   :  { %v492_v11 = vmax.f32 %v438_v62, 0.0  ;;  %v1259_v62 = vld [vmem:[%s2034_s6] ss:$0 sm:$0xff] }
 0x232   :  { %v490_v3 = vmax.f32 %v430_v0, 0.0 }
 0x233   :  { %v506_v4 = vpack.c.bf16 %v492_v11, %v491_v1 }
 0x234   :  { %v505_v5 = vpack.c.bf16 %v490_v3, %v489_v2  ;;  %v1516_v6 = vpop.f32.mrb[4].mxu1 }
 0x235   :  { %v451_v7 = vadd.f32 %v1516_v6, %v1250_v56  ;;  %v442_v8 = vpop.f32.mrb[5].mxu1 }
 0x236   :  { %v443_v9 = vadd.f32 %v1250_v56, %v442_v8  ;;  %v1517_v10 = vpop.f32.mrb[6].mxu1  ;;  %1542 = vmatprep.mubr.bf16.mxu0 %v505_v5 }
 0x237   :  { %v454_v12 = vadd.f32 %v1517_v10, %v1250_v56  ;;  %v445_v13 = vpop.f32.mrb[7].mxu1  ;;  %1543 = vmatmul.mubr.bf16.vlgmr.msra.gmra.mrb[16].mxu0 %v506_v4  ;;  %v495_v15 = vmax.f32 %v451_v7, 0.0 }
 0x238   :  { %v446_v14 = vadd.f32 %v1250_v56, %v445_v13  ;;  %v493_v17 = vmax.f32 %v443_v9, 0.0  ;;  %1591 = vmatpush3.bf16.msra.mxu0 %v1688_v57 }
 0x239   :  { %v496_v16 = vmax.f32 %v454_v12, 0.0  ;;  %1592 = vmatprep.subr.bf16.mxu0 %v1689_v58 }
 0x23a   :  { %v494_v18 = vmax.f32 %v446_v14, 0.0 }
 0x23b   :  { %v508_v19 = vpack.c.bf16 %v496_v16, %v495_v15 }
 0x23c   :  { %v507_v20 = vpack.c.bf16 %v494_v18, %v493_v17  ;;  %v1520_v21 = vpop.f32.mrb[8].mxu1  ;;  %1593 = vmatpush3.bf16.msra.mxu0 %v1689_v58 }
 0x23d   :  { %v467_v22 = vadd.f32 %v1520_v21, %v1250_v56  ;;  %v458_v23 = vpop.f32.mrb[9].mxu1  ;;  %1594 = vmatprep.subr.bf16.mxu0 %v1690_v59 }
 0x23e   :  { %v459_v24 = vadd.f32 %v1250_v56, %v458_v23  ;;  %v1521_v25 = vpop.f32.mrb[10].mxu1  ;;  %1546 = vmatprep.mubr.bf16.mxu0 %v507_v20 }
 0x23f   :  { %v470_v26 = vadd.f32 %v1521_v25, %v1250_v56  ;;  %v461_v27 = vpop.f32.mrb[11].mxu1  ;;  %1547 = vmatmul.mubr.bf16.gmra.mrb[20].mxu0 %v508_v19  ;;  %v499_v29 = vmax.f32 %v467_v22, 0.0 }
 0x240   :  { %v462_v28 = vadd.f32 %v1250_v56, %v461_v27  ;;  %v497_v38 = vmax.f32 %v459_v24, 0.0  ;;  %1595 = vmatpush3.bf16.msra.mxu0 %v1690_v59 }
 0x241   :  { %v500_v30 = vmax.f32 %v470_v26, 0.0  ;;  %1596 = vmatprep.subr.bf16.mxu0 %v1691_v60 }
 0x242   :  { %v498_v39 = vmax.f32 %v462_v28, 0.0 }
 0x243   :  { %v510_v40 = vpack.c.bf16 %v500_v30, %v499_v29 }
 0x244   :  { %v509_v41 = vpack.c.bf16 %v498_v39, %v497_v38  ;;  %v1524_v42 = vpop.f32.mrb[12].mxu1  ;;  %1597 = vmatpush3.bf16.msra.mxu0 %v1691_v60 }
 0x245   :  { %v483_v43 = vadd.f32 %v1524_v42, %v1250_v56  ;;  %v474_v44 = vpop.f32.mrb[13].mxu1 }
 0x246   :  { %v475_v45 = vadd.f32 %v1250_v56, %v474_v44  ;;  %v1525_v46 = vpop.f32.mrb[14].mxu1  ;;  %1550 = vmatprep.mubr.bf16.mxu0 %v509_v41 }
 0x247   :  { %v486_v47 = vadd.f32 %v1525_v46, %v1250_v56  ;;  %v477_v48 = vpop.f32.mrb[15].mxu1  ;;  %1551 = vmatmul.mubr.bf16.gmra.mrb[24].mxu0 %v510_v40  ;;  %v503_v50 = vmax.f32 %v483_v43, 0.0 }
 0x248   :  { %v478_v49 = vadd.f32 %v1250_v56, %v477_v48  ;;  %v501_v52 = vmax.f32 %v475_v45, 0.0  ;;  %v1692_v56 = vld [vmem:[#allocation8 + $0x60] sm:$0xff]  }
 0x249   :  { %v504_v51 = vmax.f32 %v486_v47, 0.0  ;;  %1598 = vmatprep.subr.bf16.mxu0 %v1692_v56 }
 0x24a   :  { %v502_v53 = vmax.f32 %v478_v49, 0.0  ;;  %1599 = vmatpush3.bf16.msra.mxu0 %v1692_v56 }
 0x24b   :  { %v512_v54 = vpack.c.bf16 %v504_v51, %v503_v50  ;;  %1600 = vmatprep.subr.bf16.mxu0 %v1693_v61 }
 0x24c   :  { %v511_v55 = vpack.c.bf16 %v502_v53, %v501_v52 }
 0x24e   :  { %1554 = vmatprep.mubr.bf16.mxu0 %v511_v55  ;;  %1601 = vmatpush3.bf16.msra.mxu0 %v1693_v61 }
 0x24f   :  { %1555 = vmatmul.mubr.bf16.gmra.mrb[28].mxu0 %v512_v54 }
 0x30a   :  { %v1544_v63 = vpop.f32.mrb[16].mxu0 }
 0x30b   :  { %v627_v0 = vadd.f32 %v1544_v63, %v1259_v62  ;;  %v618_v1 = vpop.f32.mrb[17].mxu0  ;;  %v1695_v63 = vld [vmem:[#allocation8 + $0x78] sm:$0xff]  }
 0x30c   :  { %v619_v11 = vadd.f32 %v1259_v62, %v618_v1  ;;  %v1545_v2 = vpop.f32.mrb[18].mxu0 }
 0x30d   :  { %v630_v3 = vadd.f32 %v1545_v2, %v1259_v62  ;;  %v621_v4 = vpop.f32.mrb[19].mxu0  ;;  %v683_v6 = vmax.f32 %v627_v0, 0.0  ;;  %v1696_v0 = vld [vmem:[#allocation10 + $0x40] sm:$0xff]  }
 0x30e   :  { %v622_v5 = vadd.f32 %v1259_v62, %v621_v4  ;;  %v681_v8 = vmax.f32 %v619_v11, 0.0 }
 0x30f   :  { %v684_v7 = vmax.f32 %v630_v3, 0.0 }
 0x310   :  { %v682_v9 = vmax.f32 %v622_v5, 0.0 }
 0x311   :  { %v698_v10 = vpack.c.bf16 %v684_v7, %v683_v6 }
 0x312   :  { %v697_v12 = vpack.c.bf16 %v682_v9, %v681_v8  ;;  %v1548_v13 = vpop.f32.mrb[20].mxu0 }
 0x313   :  { %v643_v14 = vadd.f32 %v1548_v13, %v1259_v62  ;;  %v634_v15 = vpop.f32.mrb[21].mxu0  ;;  %v1361_v13 = vld [vmem:[#allocation7 + $0x58] sm:$0xff]  }
 0x314   :  { %v635_v16 = vadd.f32 %v1259_v62, %v634_v15  ;;  %v1549_v17 = vpop.f32.mrb[22].mxu0  ;;  %1558 = vmatprep.subr.bf16.mxu1 %v697_v12  ;;  %v1360_v15 = vld [vmem:[#allocation7 + $0x50] sm:$0xff]  }
 0x315   :  { %v646_v18 = vadd.f32 %v1549_v17, %v1259_v62  ;;  %v637_v19 = vpop.f32.mrb[23].mxu0  ;;  %1559 = vmatpush3.bf16.msra.mxu1 %v697_v12  ;;  %v687_v21 = vmax.f32 %v643_v14, 0.0  ;;  %v1334_v17 = vunpack.c.l.bf16 %v1361_v13 }
 0x316   :  { %v638_v20 = vadd.f32 %v1259_v62, %v637_v19  ;;  %1560 = vmatprep.subr.bf16.mxu1 %v698_v10  ;;  %v685_v23 = vmax.f32 %v635_v16, 0.0 }
 0x317   :  { %v688_v22 = vmax.f32 %v646_v18, 0.0  ;;  %v1335_v18 = vunpack.c.h.bf16 %v1361_v13 }
 0x318   :  { %v686_v24 = vmax.f32 %v638_v20, 0.0  ;;  %v1330_v20 = vunpack.c.l.bf16 %v1360_v15 }
 0x319   :  { %v700_v25 = vpack.c.bf16 %v688_v22, %v687_v21  ;;  %1561 = vmatpush3.bf16.msra.mxu1 %v698_v10  ;;  %v1331_v21 = vunpack.c.h.bf16 %v1360_v15 }
 0x31a   :  { %v699_v26 = vpack.c.bf16 %v686_v24, %v685_v23  ;;  %v1552_v27 = vpop.f32.mrb[24].mxu0 }
 0x31b   :  { %v659_v28 = vadd.f32 %v1552_v27, %v1259_v62  ;;  %v650_v29 = vpop.f32.mrb[25].mxu0 }
 0x31c   :  { %v651_v30 = vadd.f32 %v1259_v62, %v650_v29  ;;  %v1553_v38 = vpop.f32.mrb[26].mxu0  ;;  %1562 = vmatprep.subr.bf16.mxu1 %v699_v26  ;;  %v1363_v29 = vld [vmem:[#allocation7 + $0x68] sm:$0xff]  }
 0x31d   :  { %v662_v39 = vadd.f32 %v1553_v38, %v1259_v62  ;;  %v653_v40 = vpop.f32.mrb[27].mxu0  ;;  %1563 = vmatpush3.bf16.msra.mxu1 %v699_v26  ;;  %v691_v42 = vmax.f32 %v659_v28, 0.0  ;;  %v1362_v38 = vld [vmem:[#allocation7 + $0x60] sm:$0xff]  }
 0x31e   :  { %v654_v41 = vadd.f32 %v1259_v62, %v653_v40  ;;  %1564 = vmatprep.subr.bf16.mxu1 %v700_v25  ;;  %v689_v44 = vmax.f32 %v651_v30, 0.0  ;;  %v1342_v40 = vunpack.c.l.bf16 %v1363_v29 }
 0x31f   :  { %v692_v43 = vmax.f32 %v662_v39, 0.0 }
 0x320   :  { %v690_v45 = vmax.f32 %v654_v41, 0.0  ;;  %v1343_v41 = vunpack.c.h.bf16 %v1363_v29 }
 0x321   :  { %v702_v46 = vpack.c.bf16 %v692_v43, %v691_v42  ;;  %1565 = vmatpush3.bf16.msra.mxu1 %v700_v25  ;;  %v1338_v43 = vunpack.c.l.bf16 %v1362_v38 }
 0x322   :  { %v701_v47 = vpack.c.bf16 %v690_v45, %v689_v44  ;;  %v1556_v48 = vpop.f32.mrb[28].mxu0  ;;  %v1339_v44 = vunpack.c.h.bf16 %v1362_v38 }
 0x323   :  { %v675_v49 = vadd.f32 %v1556_v48, %v1259_v62  ;;  %v666_v50 = vpop.f32.mrb[29].mxu0 }
 0x324   :  { %v667_v51 = vadd.f32 %v1259_v62, %v666_v50  ;;  %v1557_v52 = vpop.f32.mrb[30].mxu0  ;;  %1566 = vmatprep.subr.bf16.mxu1 %v701_v47 }
 0x325   :  { %v678_v53 = vadd.f32 %v1557_v52, %v1259_v62  ;;  %v669_v54 = vpop.f32.mrb[31].mxu0  ;;  %1567 = vmatpush3.bf16.msra.mxu1 %v701_v47  ;;  %v695_v57 = vmax.f32 %v675_v49, 0.0  ;;  %v1365_v52 = vld [vmem:[#allocation7 + $0x78] sm:$0xff]  }
 0x326   :  { %v670_v55 = vadd.f32 %v1259_v62, %v669_v54  ;;  %1568 = vmatprep.subr.bf16.mxu1 %v702_v46  ;;  %v693_v59 = vmax.f32 %v667_v51, 0.0  ;;  %v1694_v62 = vld [vmem:[#allocation8 + $0x70] sm:$0xff]  }
 0x327   :  { %v696_v58 = vmax.f32 %v678_v53, 0.0  ;;  %1602 = vmatprep.subr.bf16.mxu0 %v1694_v62  ;;  %v1364_v54 = vld [vmem:[#allocation7 + $0x70] sm:$0xff]  }
 0x328   :  { %v694_v60 = vmax.f32 %v670_v55, 0.0  ;;  %1603 = vmatpush3.bf16.msra.mxu0 %v1694_v62 }
 0x329   :  { %v704_v56 = vpack.c.bf16 %v696_v58, %v695_v57  ;;  %1569 = vmatpush3.bf16.msra.mxu1 %v702_v46  ;;  %1604 = vmatprep.subr.bf16.mxu0 %v1695_v63  ;;  %v1350_v57 = vunpack.c.l.bf16 %v1365_v52  ;;  %v1351_v58 = vunpack.c.h.bf16 %v1365_v52 }
 0x32a   :  { %v703_v61 = vpack.c.bf16 %v694_v60, %v693_v59  ;;  %v1346_v60 = vunpack.c.l.bf16 %v1364_v54 }
 0x32c   :  { %1570 = vmatprep.subr.bf16.mxu1 %v703_v61  ;;  %1605 = vmatpush3.bf16.msra.mxu0 %v1695_v63 }
 0x32d   :  { %1571 = vmatpush3.bf16.msra.mxu1 %v703_v61 }
 0x32e   :  { %1572 = vmatprep.subr.bf16.mxu1 %v704_v56 }
 0x331   :  { %1573 = vmatpush3.bf16.msra.mxu1 %v704_v56  ;;  %v1347_v56 = vunpack.c.h.bf16 %v1364_v54 }
 0x332   :  { %1622 = vmatprep.subr.bf16.mxu1 %v1696_v0 }
 0x334   :  { %1575 = vmatmul.mubr.bf16.vlgmr.msra.gmra.mrb[16].mxu1 %v1972_v31  ;;  %v1697_v31 = vld [vmem:[#allocation10 + $0x48] sm:$0xff]  }
 0x335   :  { %1578 = vmatprep.mubr.bf16.mxu1 %v1974_v32  ;;  %1623 = vmatpush3.bf16.msra.mxu1 %v1696_v0  ;;  %v1698_v32 = vld [vmem:[#allocation10 + $0x50] sm:$0xff]  }
 0x336   :  { %1624 = vmatprep.subr.bf16.mxu1 %v1697_v31 }
 0x339   :  { %1625 = vmatpush3.bf16.msra.mxu1 %v1697_v31 }
 0x33a   :  { %1626 = vmatprep.subr.bf16.mxu1 %v1698_v32 }
 0x33c   :  { %1579 = vmatmul.mubr.bf16.gmra.mrb[20].mxu1 %v1978_v33  ;;  %v1699_v33 = vld [vmem:[#allocation10 + $0x58] sm:$0xff]  }
 0x33d   :  { %1582 = vmatprep.mubr.bf16.mxu1 %v1980_v34  ;;  %1627 = vmatpush3.bf16.msra.mxu1 %v1698_v32  ;;  %v1700_v34 = vld [vmem:[#allocation10 + $0x60] sm:$0xff]  }
 0x33e   :  { %1628 = vmatprep.subr.bf16.mxu1 %v1699_v33 }
 0x341   :  { %1629 = vmatpush3.bf16.msra.mxu1 %v1699_v33 }
 0x342   :  { %1630 = vmatprep.subr.bf16.mxu1 %v1700_v34 }
 0x344   :  { %1583 = vmatmul.mubr.bf16.gmra.mrb[24].mxu1 %v1984_v35  ;;  %v1701_v35 = vld [vmem:[#allocation10 + $0x68] sm:$0xff]  }
 0x345   :  { %1586 = vmatprep.mubr.bf16.mxu1 %v1986_v36  ;;  %1631 = vmatpush3.bf16.msra.mxu1 %v1700_v34  ;;  %v1359_v36 = vld [vmem:[#allocation7 + $0x48] sm:$0xff]  }
 0x346   :  { %1632 = vmatprep.subr.bf16.mxu1 %v1701_v35  ;;  %v1326_v1 = vunpack.c.l.bf16 %v1359_v36  ;;  %v1327_v11 = vunpack.c.h.bf16 %v1359_v36  ;;  %v1702_v36 = vld [vmem:[#allocation10 + $0x70] sm:$0xff]  }
 0x349   :  { %1633 = vmatpush3.bf16.msra.mxu1 %v1701_v35 }
 0x34a   :  { %1634 = vmatprep.subr.bf16.mxu1 %v1702_v36 }
 0x34c   :  { %1587 = vmatmul.mubr.bf16.gmra.mrb[28].mxu1 %v1990_v37  ;;  %v1321_v37 = vld [vmem:[#allocation7 + $0x40] sm:$0xff]  }
 0x34d   :  { %v1322_v3 = vunpack.c.l.bf16 %v1321_v37  ;;  %v1323_v4 = vunpack.c.h.bf16 %v1321_v37  ;;  %1635 = vmatpush3.bf16.msra.mxu1 %v1702_v36  ;;  %v1703_v37 = vld [vmem:[#allocation10 + $0x78] sm:$0xff]  }
 0x34e   :  { %1636 = vmatprep.subr.bf16.mxu1 %v1703_v37 }
 0x351   :  { %1637 = vmatpush3.bf16.msra.mxu1 %v1703_v37 }
 0x407   :  { %v1576_v2 = vpop.f32.mrb[16].mxu1 }
 0x408   :  { %v772_v5 = vpop.f32.mrb[17].mxu1  ;;  %v781_v7 = vadd.f32 %v1576_v2, %v1326_v1  ;;  %v1269_v1 = vld [vmem:[%s2032_s4 + $0x1] ss:$0 sm:$0xff] }
 0x409   :  { %v1577_v6 = vpop.f32.mrb[18].mxu1  ;;  %v773_v10 = vadd.f32 %v1322_v3, %v772_v5 }
 0x40a   :  { %v784_v8 = vadd.f32 %v1577_v6, %v1327_v11  ;;  %v775_v9 = vpop.f32.mrb[19].mxu1 }
 0x40b   :  { %v776_v12 = vadd.f32 %v1323_v4, %v775_v9 }
 0x40c   :  { %v836_v14 = vpack.c.bf16 %v784_v8, %v781_v7 }
 0x40d   :  { %v835_v16 = vpack.c.bf16 %v776_v12, %v773_v10 }
 0x40f   :  { %v1580_v19 = vpop.f32.mrb[20].mxu1  ;;  %1606 = vmatprep.mubr.bf16.mxu0 %v835_v16 }
 0x410   :  { %v788_v22 = vpop.f32.mrb[21].mxu1  ;;  %1607 = vmatmul.mubr.bf16.vlgmr.msra.gmra.mrb[32].mxu0 %v836_v14  ;;  %v797_v24 = vadd.f32 %v1580_v19, %v1334_v17 }
 0x411   :  { %v1581_v23 = vpop.f32.mrb[22].mxu1  ;;  %v789_v27 = vadd.f32 %v1330_v20, %v788_v22 }
 0x412   :  { %v800_v25 = vadd.f32 %v1581_v23, %v1335_v18  ;;  %v791_v26 = vpop.f32.mrb[23].mxu1 }
 0x413   :  { %v792_v28 = vadd.f32 %v1331_v21, %v791_v26 }
 0x414   :  { %v838_v30 = vpack.c.bf16 %v800_v25, %v797_v24 }
 0x415   :  { %v837_v39 = vpack.c.bf16 %v792_v28, %v789_v27 }
 0x417   :  { %v1584_v42 = vpop.f32.mrb[24].mxu1  ;;  %1610 = vmatprep.mubr.bf16.mxu0 %v837_v39 }
 0x418   :  { %v804_v45 = vpop.f32.mrb[25].mxu1  ;;  %1611 = vmatmul.mubr.bf16.gmra.mrb[36].mxu0 %v838_v30  ;;  %v813_v47 = vadd.f32 %v1584_v42, %v1342_v40 }
 0x419   :  { %v1585_v46 = vpop.f32.mrb[26].mxu1  ;;  %v805_v50 = vadd.f32 %v1338_v43, %v804_v45 }
 0x41a   :  { %v816_v48 = vadd.f32 %v1585_v46, %v1343_v41  ;;  %v807_v49 = vpop.f32.mrb[27].mxu1 }
 0x41b   :  { %v808_v51 = vadd.f32 %v1339_v44, %v807_v49 }
 0x41c   :  { %v840_v53 = vpack.c.bf16 %v816_v48, %v813_v47 }
 0x41d   :  { %v839_v55 = vpack.c.bf16 %v808_v51, %v805_v50 }
 0x41f   :  { %v1588_v59 = vpop.f32.mrb[28].mxu1  ;;  %1614 = vmatprep.mubr.bf16.mxu0 %v839_v55 }
 0x420   :  { %v820_v61 = vpop.f32.mrb[29].mxu1  ;;  %1615 = vmatmul.mubr.bf16.gmra.mrb[40].mxu0 %v840_v53  ;;  %v829_v63 = vadd.f32 %v1588_v59, %v1350_v57 }
 0x421   :  { %v1589_v62 = vpop.f32.mrb[30].mxu1  ;;  %v821_v32 = vadd.f32 %v1346_v60, %v820_v61 }
 0x422   :  { %v832_v0 = vadd.f32 %v1589_v62, %v1351_v58  ;;  %v823_v31 = vpop.f32.mrb[31].mxu1 }
 0x423   :  { %v824_v33 = vadd.f32 %v1347_v56, %v823_v31  ;;  %v1279_v31 = vld [vmem:[%s2034_s6 + $0x1] ss:$0 sm:$0xff]  ;;  %s1853_s6 = smov [#allocation11]  }
 0x424   :  { %v842_v34 = vpack.c.bf16 %v832_v0, %v829_v63  ;;  %s1228_s24 = sshll.u32 %s1853_s6, 4  ;;  %s1229_s24 = int_to_ptr.vmem [resolvable:$true] %s1228_s24 }
 0x425   :  { %v841_v35 = vpack.c.bf16 %v824_v33, %v821_v32  ;;  %s1814_s26 = scalar_lea.vmem %s1229_s24, 2048  ;;  %p1819_p13 = scmp.lt.s32.totalorder %s1229_s24, %s1229_s24 }
 0x426   :  { %p1815_p12 = scmp.ne.s32.totalorder %s1229_s24, %s1814_s26  ;;  %p1820_p0 = scmp.lt.s32.totalorder %s1814_s26, %s1814_s26 }
 0x427   :  { %1618 = vmatprep.mubr.bf16.mxu0 %v841_v35 }
 0x428   :  { %1619 = vmatmul.mubr.bf16.gmra.mrb[44].mxu0 %v842_v34  ;;  %p1821_p1 = por %p1820_p0, %p1819_p13 }
 0x42a   :  { %p1822_p2 = pnand %p1821_p1, %p1815_p12 }
 0x4e3   :  { %v1608_v11 = vpop.f32.mrb[32].mxu0 }
 0x4e4   :  { %v959_v2 = vadd.f32 %v1608_v11, %v1269_v1  ;;  %v950_v3 = vpop.f32.mrb[33].mxu0 }
 0x4e5   :  { %v951_v4 = vadd.f32 %v1269_v1, %v950_v3  ;;  %v1609_v5 = vpop.f32.mrb[34].mxu0 }
 0x4e6   :  { %v962_v6 = vadd.f32 %v1609_v5, %v1269_v1  ;;  %v953_v7 = vpop.f32.mrb[35].mxu0  ;;  %v1015_v9 = vmax.f32 %v959_v2, 0.0 }
 0x4e7   :  { %v954_v8 = vadd.f32 %v1269_v1, %v953_v7  ;;  %v1013_v12 = vmax.f32 %v951_v4, 0.0 }
 0x4e8   :  { %v1016_v10 = vmax.f32 %v962_v6, 0.0 }
 0x4e9   :  { %v1014_v13 = vmax.f32 %v954_v8, 0.0 }
 0x4ea   :  { %v1030_v14 = vpack.c.bf16 %v1016_v10, %v1015_v9 }
 0x4eb   :  { %v1029_v15 = vpack.c.bf16 %v1014_v13, %v1013_v12  ;;  %v1612_v16 = vpop.f32.mrb[36].mxu0 }
 0x4ec   :  { %v975_v17 = vadd.f32 %v1612_v16, %v1269_v1  ;;  %v966_v18 = vpop.f32.mrb[37].mxu0 }
 0x4ed   :  { %v967_v19 = vadd.f32 %v1269_v1, %v966_v18  ;;  %v1613_v20 = vpop.f32.mrb[38].mxu0  ;;  %1638 = vmatprep.mubr.bf16.mxu1 %v1029_v15 }
 0x4ee   :  { %v978_v21 = vadd.f32 %v1613_v20, %v1269_v1  ;;  %v969_v22 = vpop.f32.mrb[39].mxu0  ;;  %1639 = vmatmul.mubr.bf16.vlgmr.msra.gmra.mrb[32].mxu1 %v1030_v14  ;;  %v1019_v24 = vmax.f32 %v975_v17, 0.0 }
 0x4ef   :  { %v970_v23 = vadd.f32 %v1269_v1, %v969_v22  ;;  %v1017_v26 = vmax.f32 %v967_v19, 0.0 }
 0x4f0   :  { %v1020_v25 = vmax.f32 %v978_v21, 0.0 }
 0x4f1   :  { %v1018_v27 = vmax.f32 %v970_v23, 0.0 }
 0x4f2   :  { %v1032_v28 = vpack.c.bf16 %v1020_v25, %v1019_v24 }
 0x4f3   :  { %v1031_v29 = vpack.c.bf16 %v1018_v27, %v1017_v26  ;;  %v1616_v30 = vpop.f32.mrb[40].mxu0 }
 0x4f4   :  { %v991_v38 = vadd.f32 %v1616_v30, %v1269_v1  ;;  %v982_v39 = vpop.f32.mrb[41].mxu0 }
 0x4f5   :  { %v983_v40 = vadd.f32 %v1269_v1, %v982_v39  ;;  %v1617_v41 = vpop.f32.mrb[42].mxu0  ;;  %1642 = vmatprep.mubr.bf16.mxu1 %v1031_v29 }
 0x4f6   :  { %v994_v42 = vadd.f32 %v1617_v41, %v1269_v1  ;;  %v985_v43 = vpop.f32.mrb[43].mxu0  ;;  %1643 = vmatmul.mubr.bf16.gmra.mrb[36].mxu1 %v1032_v28  ;;  %v1023_v45 = vmax.f32 %v991_v38, 0.0 }
 0x4f7   :  { %v986_v44 = vadd.f32 %v1269_v1, %v985_v43  ;;  %v1021_v47 = vmax.f32 %v983_v40, 0.0 }
 0x4f8   :  { %v1024_v46 = vmax.f32 %v994_v42, 0.0 }
 0x4f9   :  { %v1022_v48 = vmax.f32 %v986_v44, 0.0 }
 0x4fa   :  { %v1034_v49 = vpack.c.bf16 %v1024_v46, %v1023_v45 }
 0x4fb   :  { %v1033_v50 = vpack.c.bf16 %v1022_v48, %v1021_v47  ;;  %v1620_v51 = vpop.f32.mrb[44].mxu0 }
 0x4fc   :  { %v1007_v52 = vadd.f32 %v1620_v51, %v1269_v1  ;;  %v998_v53 = vpop.f32.mrb[45].mxu0 }
 0x4fd   :  { %v999_v54 = vadd.f32 %v1269_v1, %v998_v53  ;;  %v1621_v55 = vpop.f32.mrb[46].mxu0  ;;  %1646 = vmatprep.mubr.bf16.mxu1 %v1033_v50 }
 0x4fe   :  { %v1010_v57 = vadd.f32 %v1621_v55, %v1269_v1  ;;  %v1001_v58 = vpop.f32.mrb[47].mxu0  ;;  %1647 = vmatmul.mubr.bf16.gmra.mrb[40].mxu1 %v1034_v49  ;;  %v1027_v60 = vmax.f32 %v1007_v52, 0.0 }
 0x4ff   :  { %v1002_v59 = vadd.f32 %v1269_v1, %v1001_v58  ;;  %v1025_v61 = vmax.f32 %v999_v54, 0.0 }
 0x500   :  { %v1028_v56 = vmax.f32 %v1010_v57, 0.0 }
 0x501   :  { %v1026_v62 = vmax.f32 %v1002_v59, 0.0 }
 0x502   :  { %v1036_v63 = vpack.c.bf16 %v1028_v56, %v1027_v60 }
 0x503   :  { %v1035_v0 = vpack.c.bf16 %v1026_v62, %v1025_v61 }
 0x505   :  { %1650 = vmatprep.mubr.bf16.mxu1 %v1035_v0 }
 0x506   :  { %1651 = vmatmul.mubr.bf16.gmra.mrb[44].mxu1 %v1036_v63 }
 0x5c1   :  { %v1640_v32 = vpop.f32.mrb[32].mxu1 }
 0x5c2   :  { %v1153_v33 = vadd.f32 %v1640_v32, %v1279_v31  ;;  %v1144_v34 = vpop.f32.mrb[33].mxu1 }
 0x5c3   :  { %v1145_v35 = vadd.f32 %v1279_v31, %v1144_v34  ;;  %v1641_v36 = vpop.f32.mrb[34].mxu1 }
 0x5c4   :  { %1209 = vst [vmem:[#allocation11 + $0x10] sm:$0xff] %v1153_v33  ;;  %v1156_v37 = vadd.f32 %v1641_v36, %v1279_v31  ;;  %v1147_v1 = vpop.f32.mrb[35].mxu1 }
 0x5c5   :  { %1207 = vst [vmem:[#allocation11] sm:$0xff] %v1145_v35  ;;  %v1148_v11 = vadd.f32 %v1279_v31, %v1147_v1 }
 0x5c6   :  { %1210 = vst [vmem:[#allocation11 + $0x18] sm:$0xff] %v1156_v37 }
 0x5c7   :  { %1208 = vst [vmem:[#allocation11 + $0x8] sm:$0xff] %v1148_v11 }
 0x5c9   :  { %v1644_v2 = vpop.f32.mrb[36].mxu1 }
 0x5ca   :  { %v1169_v3 = vadd.f32 %v1644_v2, %v1279_v31  ;;  %v1160_v4 = vpop.f32.mrb[37].mxu1 }
 0x5cb   :  { %v1161_v5 = vadd.f32 %v1279_v31, %v1160_v4  ;;  %v1645_v6 = vpop.f32.mrb[38].mxu1 }
 0x5cc   :  { %1213 = vst [vmem:[#allocation11 + $0x30] sm:$0xff] %v1169_v3  ;;  %v1172_v7 = vadd.f32 %v1645_v6, %v1279_v31  ;;  %v1163_v8 = vpop.f32.mrb[39].mxu1 }
 0x5cd   :  { %1211 = vst [vmem:[#allocation11 + $0x20] sm:$0xff] %v1161_v5  ;;  %v1164_v9 = vadd.f32 %v1279_v31, %v1163_v8 }
 0x5ce   :  { %1214 = vst [vmem:[#allocation11 + $0x38] sm:$0xff] %v1172_v7 }
 0x5cf   :  { %1212 = vst [vmem:[#allocation11 + $0x28] sm:$0xff] %v1164_v9 }
 0x5d1   :  { %v1648_v10 = vpop.f32.mrb[40].mxu1 }
 0x5d2   :  { %v1185_v12 = vadd.f32 %v1648_v10, %v1279_v31  ;;  %v1176_v13 = vpop.f32.mrb[41].mxu1 }
 0x5d3   :  { %v1177_v14 = vadd.f32 %v1279_v31, %v1176_v13  ;;  %v1649_v15 = vpop.f32.mrb[42].mxu1 }
 0x5d4   :  { %1217 = vst [vmem:[#allocation11 + $0x50] sm:$0xff] %v1185_v12  ;;  %v1188_v16 = vadd.f32 %v1649_v15, %v1279_v31  ;;  %v1179_v17 = vpop.f32.mrb[43].mxu1 }
 0x5d5   :  { %1215 = vst [vmem:[#allocation11 + $0x40] sm:$0xff] %v1177_v14  ;;  %v1180_v18 = vadd.f32 %v1279_v31, %v1179_v17 }
 0x5d6   :  { %1218 = vst [vmem:[#allocation11 + $0x58] sm:$0xff] %v1188_v16 }
 0x5d7   :  { %1216 = vst [vmem:[#allocation11 + $0x48] sm:$0xff] %v1180_v18 }
 0x5d9   :  { %v1652_v19 = vpop.f32.mrb[44].mxu1 }
 0x5da   :  { %v1201_v20 = vadd.f32 %v1652_v19, %v1279_v31  ;;  %v1192_v21 = vpop.f32.mrb[45].mxu1 }
 0x5db   :  { %v1193_v22 = vadd.f32 %v1279_v31, %v1192_v21  ;;  %v1653_v23 = vpop.f32.mrb[46].mxu1 }
 0x5dc   :  { %1221 = vst [vmem:[#allocation11 + $0x70] sm:$0xff] %v1201_v20  ;;  %v1204_v24 = vadd.f32 %v1653_v23, %v1279_v31  ;;  %v1195_v25 = vpop.f32.mrb[47].mxu1 }
 0x5dd   :  { %1219 = vst [vmem:[#allocation11 + $0x60] sm:$0xff] %v1193_v22  ;;  %v1196_v26 = vadd.f32 %v1279_v31, %v1195_v25 }
 0x5de   :  { %1222 = vst [vmem:[#allocation11 + $0x78] sm:$0xff] %v1204_v24 }
 0x5df   :  { %1220 = vst [vmem:[#allocation11 + $0x68] sm:$0xff] %v1196_v26 }
 0x5e0   :  { %1825 = shalt.err (!%p1822_p2)
}
 0x5e1   :  { %s1826_s29 = scalar_lea.hbm %s2035_s7, 2048 }
 0x5e2   :  { %p1827_p3 = scmp.ne.s32.totalorder %s2035_s7, %s1826_s29  ;;  %p1830_p4 = scmp.lt.u32.totalorder %s1826_s29, %s2035_s7 }
 0x5e4   :  { %p1832_p5 = pnand %p1830_p4, %p1827_p3 }
 0x5e6   :  { %1835 = shalt.err (!%p1832_p5)
}
 0x5e7   :  { %1234 = dma.vmem_to_hbm [thread:$0]  %s1229_s24, 2048, %s2035_s7, [#allocation4], %s1845_s11, %s1845_s11, %s1846_s12  }
 0x5e8   :  { %1842 = dma.done.wait [#allocation4], 2048  }
 0x5e9   :  { %1843 = vsyncadd [#allocation4], 4294965248 }
 0x5ea   :  { %1238 = vsyncpa [#allocation3], 1 }
 0x5eb   :  { %1239 = vsyncpa [#allocation6], 1 }
 0x5ec   :  { %1240 = vsyncpa [#allocation9], 1 }
 0x5ed   :  { %1241 = vsyncpa [#allocation4], 1 }

</bundles_post_ra>
